<compile_context>
chip_gen: v6e
topology: v6e:2x2x1
jax: 0.10.0
libtpu: 0.0.40
codegen_flags: <defaults>
</compile_context>

<pallas_src>
import functools

import jax
import jax.numpy as jnp
from jax.experimental import pallas as pl
from jax.experimental.pallas import tpu as pltpu

N_CLASSES = 15
ANCHOR_WEIGHT = 0.1
LOSS_WEIGHT = 1.0
TILE_N = 32768   # lane tile (multiple of 128); clamped down for small N
NUM_CORES = 2    # leading "parallel" grid axis (v7x megacore); harmless on 1-TC chips


def _round_up(x: int, m: int) -> int:
    return ((x + m - 1) // m) * m


def _cdiv(a: int, b: int) -> int:
    return (a + b - 1) // b


def _anchor_ce_kernel(logits_ref, label_ref, out_ref, ce_acc, da_acc, mk_acc, *,
                      num_classes, n_valid, steps_per_core, needs_mask):
    p = pl.program_id(0)          # "parallel" core axis
    i = pl.program_id(1)          # "arbitrary" reduction axis

    @pl.when(i == 0)
    def _():
        ce_acc[...] = jnp.zeros_like(ce_acc)
        da_acc[...] = jnp.zeros_like(da_acc)
        mk_acc[...] = jnp.zeros_like(mk_acc)

    logits = logits_ref[...].astype(jnp.float32)            # (C, T) lane-dense
    labels = label_ref[...]                                  # (1, T) int32
    c, t = logits.shape

    if needs_mask:
        # Only generated when the grid does not exactly cover N columns
        # (ragged last block / phantom clamped block / 128-pad tail).
        base = (p * steps_per_core + i) * t
        col = base + jax.lax.broadcasted_iota(jnp.int32, (1, t), 1)
        valid = col < n_valid                                # (1, T) bool
        # NaN-safe: sanitize garbage tail columns BEFORE exp / sqrt.
        logits = jnp.where(valid, logits, 0.0)
        validf = valid.astype(jnp.float32)

    class_ids = jax.lax.broadcasted_iota(jnp.int32, (c, t), 0)
    onehot = class_ids == labels                             # (C, T) bool

    # --- cross entropy (reduction='none'), stable sublane logsumexp ---
    m = jnp.max(logits, axis=0, keepdims=True)               # (1, T)
    lse = jnp.log(jnp.sum(jnp.exp(logits - m), axis=0, keepdims=True)) + m
    logit_at_label = jnp.sum(jnp.where(onehot, logits, 0.0), axis=0, keepdims=True)
    ce = lse - logit_at_label                                # (1, T)

    # --- euclidean distance to anchors[label]; anchors = 10*I - 5.  Explicit
    #     difference form (one-hot select of +-5) for f32 accuracy; no MXU. ---
    diff = logits - jnp.where(onehot, 5.0, -5.0)             # (C, T)
    dist = jnp.sqrt(jnp.sum(diff * diff, axis=0, keepdims=True))  # (1, T)

    maskf = (labels != num_classes).astype(jnp.float32)      # (1, T)
    if needs_mask:
        ce = ce * validf
        maskf = maskf * validf

    # VPU-only vector accumulation in the hot loop.
    ce_acc[...] += ce
    da_acc[...] += dist * maskf
    mk_acc[...] += maskf

    @pl.when(i == pl.num_programs(1) - 1)
    def _():
        # Single cross-lane reduction per core; pack the 3 partial sums into a
        # lane-dense (1,128) output block (lane 0: sum ce, 1: sum dist*mask, 2: sum mask).
        ce_sum = jnp.sum(ce_acc[...], axis=1, keepdims=True)   # (1, 1)
        da_sum = jnp.sum(da_acc[...], axis=1, keepdims=True)
        mk_sum = jnp.sum(mk_acc[...], axis=1, keepdims=True)
        lane = jax.lax.broadcasted_iota(jnp.int32, (1, 128), 1)
        packed = jnp.where(lane == 0, ce_sum, 0.0)
        packed = jnp.where(lane == 1, da_sum, packed)
        packed = jnp.where(lane == 2, mk_sum, packed)
        out_ref[...] = packed


def make_anchors(n_classes: int) -> jnp.ndarray:
    # torch: anch = diag(ones(n)*5); anch = where(anch != 0, anch, -5)
    # Kept only for the pure-JAX reference; the kernel selects +-5 via one-hot.
    return jnp.where(jnp.eye(n_classes, dtype=jnp.float32) != 0.0, 5.0, -5.0)


@functools.partial(jax.jit,
                   static_argnames=("n_classes", "anchor_weight", "loss_weight", "tile_n"))
def anchor_w_cross_entropy_loss(cls_score, label, *, n_classes=N_CLASSES,
                                anchor_weight=ANCHOR_WEIGHT,
                                loss_weight=LOSS_WEIGHT, tile_n=TILE_N):
    """Pallas implementation of AnchorwCrossEntropyLoss.forward (reduction='mean',
    weight=None, class_weight=None, avg_factor=None, background_flag=False)."""
    c = cls_score.shape[-1]
    assert c == n_classes, "last dim of cls_score must equal n_classes"
    logits = cls_score.reshape(-1, c)                    # keep input dtype (f32 or bf16)
    labels = label.reshape(-1).astype(jnp.int32)
    n = logits.shape[0]

    # Lane-dense slab: classes on sublanes, batch on lanes.  Pad the lane dim only
    # to the next 128 boundary (<=127 cols) — no full tile-multiple padding pass.
    # TODO(synk): have the producing head emit the (C, N) slab (ideally bf16)
    # directly so this transpose copy disappears from HBM traffic entirely.
    logits_t = jnp.transpose(logits)                     # (C, N)
    n_pad = _round_up(n, 128)
    if n_pad != n:
        logits_t = jnp.pad(logits_t, ((0, 0), (0, n_pad - n)))
        labels = jnp.pad(labels, (0, n_pad - n), constant_values=n_classes)
    labels2d = labels.reshape(1, n_pad)

    tile = min(_round_up(tile_n, 128), n_pad)
    num_blocks = _cdiv(n_pad, tile)
    n_cores = NUM_CORES if num_blocks >= NUM_CORES else 1
    steps = _cdiv(num_blocks, n_cores)
    covered = n_cores * steps * tile
    needs_mask = covered != n                            # trace-time flag
    last_block = num_blocks - 1

    def col_block(p_, i_):
        # Clamp phantom steps (odd block counts) onto the last real block; their
        # contribution is zeroed by the in-kernel column-validity mask.
        return jnp.minimum(p_ * steps + i_, last_block)

    kernel = functools.partial(
        _anchor_ce_kernel,
        num_classes=n_classes,
        n_valid=int(n),
        steps_per_core=int(steps),
        needs_mask=bool(needs_mask),
    )

    itemsize = jnp.dtype(logits_t.dtype).itemsize
    cost = pl.CostEstimate(
        flops=int(10 * n * c),
        transcendentals=int(n * (c + 2)),
        bytes_accessed=int(n * c * itemsize + n * 4 + n_cores * 128 * 4),
    )

    partials = pl.pallas_call(
        kernel,
        out_shape=jax.ShapeDtypeStruct((1, 128 * n_cores), jnp.float32),
        grid_spec=pltpu.PrefetchScalarGridSpec(
            num_scalar_prefetch=0,
            grid=(n_cores, steps),
            in_specs=[
                pl.BlockSpec((c, tile), lambda p_, i_: (0, col_block(p_, i_))),
                pl.BlockSpec((1, tile), lambda p_, i_: (0, col_block(p_, i_))),
            ],
            out_specs=pl.BlockSpec((1, 128), lambda p_, i_: (0, p_)),
            scratch_shapes=[
                pltpu.VMEM((1, tile), jnp.float32),      # sum ce
                pltpu.VMEM((1, tile), jnp.float32),      # sum dist*mask
                pltpu.VMEM((1, tile), jnp.float32),      # sum mask
            ],
        ),
        compiler_params=pltpu.CompilerParams(
            dimension_semantics=("parallel", "arbitrary")),
        cost_estimate=cost,
    )(logits_t, labels2d)

    # Tiny JAX epilogue: combine per-core partials and apply the scalar math.
    parts = partials.reshape(n_cores, 128)
    ce_sum = jnp.sum(parts[:, 0])
    da_sum = jnp.sum(parts[:, 1])
    mk_sum = jnp.sum(parts[:, 2])
    mean_ce = ce_sum / float(n)
    loss_a = jnp.where(mk_sum > 0.0, da_sum / jnp.maximum(mk_sum, 1.0), 0.0)
    return loss_weight * (mean_ce + anchor_weight * loss_a)


def _reference(cls_score, label, *, n_classes=N_CLASSES,
               anchor_weight=ANCHOR_WEIGHT, loss_weight=LOSS_WEIGHT):
    """Pure-JAX reference mirroring the PyTorch forward (explicit anchors)."""
    logits = cls_score.reshape(-1, cls_score.shape[-1]).astype(jnp.float32)
    lab = label.reshape(-1).astype(jnp.int32)
    anchors = make_anchors(n_classes)
    onehot = jax.nn.one_hot(lab, n_classes, dtype=jnp.float32)  # zero row for lab==C
    lse = jax.scipy.special.logsumexp(logits, axis=1)
    ce = lse - jnp.sum(logits * onehot, axis=1)
    loss_ce = ce.mean()
    dists = jnp.linalg.norm(logits[:, None, :] - anchors[None, :, :], axis=-1)
    mask = (lab != n_classes).astype(jnp.float32)
    gathered = jnp.sum(dists * onehot, axis=1)
    loss_a = jnp.where(jnp.sum(mask) != 0.0,
                       jnp.sum(gathered * mask) / jnp.maximum(jnp.sum(mask), 1.0),
                       0.0)
    return loss_weight * (loss_ce + anchor_weight * loss_a)


if __name__ == "__main__":
    key = jax.random.PRNGKey(0)
    k1, k2, k3, k4 = jax.random.split(key, 4)

    # Case 1: small ROI batch (default tiling, single block, masked 128-pad tail).
    N1 = 64
    cls1 = jax.random.normal(k1, (N1, N_CLASSES), dtype=jnp.float32)
    lab1 = jax.random.randint(k2, (N1,), 0, N_CLASSES, dtype=jnp.int32)
    out1 = jax.block_until_ready(anchor_w_cross_entropy_loss(cls1, lab1))
    ref1 = jax.block_until_ready(_reference(cls1, lab1))
    assert jnp.allclose(out1, ref1, rtol=1e-4, atol=1e-4), (out1, ref1)

    # Case 2: multi-block + 2-core split + ragged/phantom tail + background labels.
    N2 = 300
    cls2 = jax.random.normal(k3, (N2, N_CLASSES), dtype=jnp.float32) * 3.0
    lab2 = jax.random.randint(k4, (N2,), 0, N_CLASSES + 1, dtype=jnp.int32)
    out2 = jax.block_until_ready(anchor_w_cross_entropy_loss(cls2, lab2, tile_n=128))
    ref2 = jax.block_until_ready(_reference(cls2, lab2))
    assert jnp.allclose(out2, ref2, rtol=1e-4, atol=1e-4), (out2, ref2)

    # Case 3: exact tiling (mask-free hot loop) + all-background (loss_a == 0 branch).
    N3 = 256
    cls3 = jax.random.normal(k1, (N3, N_CLASSES), dtype=jnp.float32)
    lab3 = jnp.full((N3,), N_CLASSES, dtype=jnp.int32)
    out3 = jax.block_until_ready(anchor_w_cross_entropy_loss(cls3, lab3, tile_n=128))
    ref3 = jax.block_until_ready(_reference(cls3, lab3))
    assert jnp.allclose(out3, ref3, rtol=1e-4, atol=1e-4), (out3, ref3)

    print("KERNEL_OK")
</pallas_src>

<mosaic_0001>
module attributes {stable_mosaic.version = 11 : i64} {
  func.func @_anchor_ce_kernel(%arg0: i32, %arg1: i32, %arg2: memref<15x128xf32, #tpu.memory_space<vmem>>, %arg3: memref<1x128xi32, #tpu.memory_space<vmem>>, %arg4: memref<1x128xf32, #tpu.memory_space<vmem>>, %arg5: memref<1x128xf32, #tpu.memory_space<vmem>>, %arg6: memref<1x128xf32, #tpu.memory_space<vmem>>, %arg7: memref<1x128xf32, #tpu.memory_space<vmem>>) attributes {dimension_semantics = [#tpu.dimension_semantics<parallel>, #tpu.dimension_semantics<arbitrary>], iteration_bounds = array<i64: 1, 1>, scalar_prefetch = 0 : i64, scratch_operands = 3 : i64, tpu.core_type = #tpu.core_type<tc>, window_params = [{transform_indices = @transform_0, window_bounds = array<i64: 15, 128>}, {transform_indices = @transform_1, window_bounds = array<i64: 1, 128>}, {transform_indices = @transform_2, window_bounds = array<i64: 1, 128>}]} {
    %c0_i32 = arith.constant 0 : i32
    %0 = arith.cmpi eq, %arg1, %c0_i32 : i32
    %1 = arith.extui %0 : i1 to i32
    %c0_i32_0 = arith.constant 0 : i32
    %2 = arith.cmpi ne, %1, %c0_i32_0 : i32
    scf.if %2 {
      %cst_25 = arith.constant 0.000000e+00 : f32
      %63 = vector.broadcast %cst_25 : f32 to vector<1x128xf32>
      %c0_26 = arith.constant 0 : index
      %c0_27 = arith.constant 0 : index
      %64 = vector.load %arg5[%c0_26, %c0_27] : memref<1x128xf32, #tpu.memory_space<vmem>>, vector<1x128xf32>
      tpu.vector_store %arg5[%c0_26, %c0_27], %63 {strides = array<i32>} : memref<1x128xf32, #tpu.memory_space<vmem>>, vector<1x128xf32>,
      %cst_28 = arith.constant 0.000000e+00 : f32
      %65 = vector.broadcast %cst_28 : f32 to vector<1x128xf32>
      %c0_29 = arith.constant 0 : index
      %c0_30 = arith.constant 0 : index
      %66 = vector.load %arg6[%c0_29, %c0_30] : memref<1x128xf32, #tpu.memory_space<vmem>>, vector<1x128xf32>
      tpu.vector_store %arg6[%c0_29, %c0_30], %65 {strides = array<i32>} : memref<1x128xf32, #tpu.memory_space<vmem>>, vector<1x128xf32>,
      %cst_31 = arith.constant 0.000000e+00 : f32
      %67 = vector.broadcast %cst_31 : f32 to vector<1x128xf32>
      %c0_32 = arith.constant 0 : index
      %c0_33 = arith.constant 0 : index
      %68 = vector.load %arg7[%c0_32, %c0_33] : memref<1x128xf32, #tpu.memory_space<vmem>>, vector<1x128xf32>
      tpu.vector_store %arg7[%c0_32, %c0_33], %67 {strides = array<i32>} : memref<1x128xf32, #tpu.memory_space<vmem>>, vector<1x128xf32>,
    } else {
    }
    %c0 = arith.constant 0 : index
    %c0_1 = arith.constant 0 : index
    %3 = vector.load %arg2[%c0, %c0_1] : memref<15x128xf32, #tpu.memory_space<vmem>>, vector<15x128xf32>
    %c0_2 = arith.constant 0 : index
    %c0_3 = arith.constant 0 : index
    %4 = vector.load %arg3[%c0_2, %c0_3] : memref<1x128xi32, #tpu.memory_space<vmem>>, vector<1x128xi32>
    %c1_i32 = arith.constant 1 : i32
    %5 = arith.muli %arg0, %c1_i32 : i32
    %6 = arith.addi %5, %arg1 : i32
    %c128_i32 = arith.constant 128 : i32
    %7 = arith.muli %6, %c128_i32 : i32
    %8 = tpu.iota {dimensions = array<i32: 1>} : vector<1x128xi32>
    %9 = vector.broadcast %7 : i32 to vector<1x128xi32>
    %10 = arith.addi %9, %8 : vector<1x128xi32>
    %c64_i32 = arith.constant 64 : i32
    %11 = vector.broadcast %c64_i32 : i32 to vector<1x128xi32>
    %12 = arith.cmpi slt, %10, %11 : vector<1x128xi32>
    %cst = arith.constant 0.000000e+00 : f32
    %13 = vector.shape_cast %12 : vector<1x128xi1> to vector<1x128xi1>
    %14 = vector.broadcast %13 : vector<1x128xi1> to vector<15x128xi1>
    %15 = vector.broadcast %cst : f32 to vector<15x128xf32>
    %16 = arith.select %14, %3, %15 : vector<15x128xi1>, vector<15x128xf32>
    %17 = arith.extui %12 : vector<1x128xi1> to vector<1x128xi32>
    %18 = arith.sitofp %17 : vector<1x128xi32> to vector<1x128xf32>
    %19 = tpu.iota {dimensions = array<i32: 0>} : vector<15x128xi32>
    %20 = vector.broadcast %4 : vector<1x128xi32> to vector<15x128xi32>
    %21 = arith.cmpi eq, %19, %20 : vector<15x128xi32>
    %cst_4 = arith.constant dense<0xFF800000> : vector<128xf32>
    %22 = vector.multi_reduction <maximumf>, %16, %cst_4 [0] : vector<15x128xf32> to vector<128xf32>
    %23 = vector.shape_cast %22 : vector<128xf32> to vector<1x128xf32>
    %24 = vector.broadcast %23 : vector<1x128xf32> to vector<15x128xf32>
    %25 = arith.subf %16, %24 : vector<15x128xf32>
    %26 = math.exp %25 : vector<15x128xf32>
    %cst_5 = arith.constant dense<0.000000e+00> : vector<128xf32>
    %27 = vector.multi_reduction <add>, %26, %cst_5 [0] : vector<15x128xf32> to vector<128xf32>
    %28 = vector.shape_cast %27 : vector<128xf32> to vector<1x128xf32>
    %29 = math.log %28 : vector<1x128xf32>
    %30 = arith.addf %29, %23 : vector<1x128xf32>
    %cst_6 = arith.constant 0.000000e+00 : f32
    %31 = vector.broadcast %cst_6 : f32 to vector<15x128xf32>
    %32 = arith.select %21, %16, %31 : vector<15x128xi1>, vector<15x128xf32>
    %cst_7 = arith.constant dense<0.000000e+00> : vector<128xf32>
    %33 = vector.multi_reduction <add>, %32, %cst_7 [0] : vector<15x128xf32> to vector<128xf32>
    %34 = vector.shape_cast %33 : vector<128xf32> to vector<1x128xf32>
    %35 = arith.subf %30, %34 : vector<1x128xf32>
    %cst_8 = arith.constant 5.000000e+00 : f32
    %cst_9 = arith.constant -5.000000e+00 : f32
    %36 = vector.broadcast %cst_8 : f32 to vector<15x128xf32>
    %37 = vector.broadcast %cst_9 : f32 to vector<15x128xf32>
    %38 = arith.select %21, %36, %37 : vector<15x128xi1>, vector<15x128xf32>
    %39 = arith.subf %16, %38 : vector<15x128xf32>
    %40 = arith.mulf %39, %39 : vector<15x128xf32>
    %cst_10 = arith.constant dense<0.000000e+00> : vector<128xf32>
    %41 = vector.multi_reduction <add>, %40, %cst_10 [0] : vector<15x128xf32> to vector<128xf32>
    %42 = vector.shape_cast %41 : vector<128xf32> to vector<1x128xf32>
    %43 = math.sqrt %42 : vector<1x128xf32>
    %c15_i32 = arith.constant 15 : i32
    %44 = vector.broadcast %c15_i32 : i32 to vector<1x128xi32>
    %45 = arith.cmpi ne, %4, %44 : vector<1x128xi32>
    %46 = arith.extui %45 : vector<1x128xi1> to vector<1x128xi32>
    %47 = arith.sitofp %46 : vector<1x128xi32> to vector<1x128xf32>
    %48 = arith.mulf %35, %18 : vector<1x128xf32>
    %49 = arith.mulf %47, %18 : vector<1x128xf32>
    %c0_11 = arith.constant 0 : index
    %c0_12 = arith.constant 0 : index
    %50 = vector.load %arg5[%c0_11, %c0_12] : memref<1x128xf32, #tpu.memory_space<vmem>>, vector<1x128xf32>
    %51 = arith.addf %50, %48 : vector<1x128xf32>
    %c0_13 = arith.constant 0 : index
    %c0_14 = arith.constant 0 : index
    %52 = vector.load %arg5[%c0_13, %c0_14] : memref<1x128xf32, #tpu.memory_space<vmem>>, vector<1x128xf32>
    tpu.vector_store %arg5[%c0_13, %c0_14], %51 {strides = array<i32>} : memref<1x128xf32, #tpu.memory_space<vmem>>, vector<1x128xf32>,
    %c0_15 = arith.constant 0 : index
    %c0_16 = arith.constant 0 : index
    %53 = vector.load %arg6[%c0_15, %c0_16] : memref<1x128xf32, #tpu.memory_space<vmem>>, vector<1x128xf32>
    %54 = arith.mulf %43, %49 : vector<1x128xf32>
    %55 = arith.addf %53, %54 : vector<1x128xf32>
    %c0_17 = arith.constant 0 : index
    %c0_18 = arith.constant 0 : index
    %56 = vector.load %arg6[%c0_17, %c0_18] : memref<1x128xf32, #tpu.memory_space<vmem>>, vector<1x128xf32>
    tpu.vector_store %arg6[%c0_17, %c0_18], %55 {strides = array<i32>} : memref<1x128xf32, #tpu.memory_space<vmem>>, vector<1x128xf32>,
    %c0_19 = arith.constant 0 : index
    %c0_20 = arith.constant 0 : index
    %57 = vector.load %arg7[%c0_19, %c0_20] : memref<1x128xf32, #tpu.memory_space<vmem>>, vector<1x128xf32>
    %58 = arith.addf %57, %49 : vector<1x128xf32>
    %c0_21 = arith.constant 0 : index
    %c0_22 = arith.constant 0 : index
    %59 = vector.load %arg7[%c0_21, %c0_22] : memref<1x128xf32, #tpu.memory_space<vmem>>, vector<1x128xf32>
    tpu.vector_store %arg7[%c0_21, %c0_22], %58 {strides = array<i32>} : memref<1x128xf32, #tpu.memory_space<vmem>>, vector<1x128xf32>,
    %c0_i32_23 = arith.constant 0 : i32
    %60 = arith.cmpi eq, %arg1, %c0_i32_23 : i32
    %61 = arith.extui %60 : i1 to i32
    %c0_i32_24 = arith.constant 0 : i32
    %62 = arith.cmpi ne, %61, %c0_i32_24 : i32
    scf.if %62 {
      %c0_25 = arith.constant 0 : index
      %c0_26 = arith.constant 0 : index
      %63 = vector.load %arg5[%c0_25, %c0_26] : memref<1x128xf32, #tpu.memory_space<vmem>>, vector<1x128xf32>
      %cst_27 = arith.constant dense<0.000000e+00> : vector<1xf32>
      %64 = vector.multi_reduction <add>, %63, %cst_27 [1] : vector<1x128xf32> to vector<1xf32>
      %65 = vector.shape_cast %64 : vector<1xf32> to vector<1x1xf32>
      %c0_28 = arith.constant 0 : index
      %c0_29 = arith.constant 0 : index
      %66 = vector.load %arg6[%c0_28, %c0_29] : memref<1x128xf32, #tpu.memory_space<vmem>>, vector<1x128xf32>
      %cst_30 = arith.constant dense<0.000000e+00> : vector<1xf32>
      %67 = vector.multi_reduction <add>, %66, %cst_30 [1] : vector<1x128xf32> to vector<1xf32>
      %68 = vector.shape_cast %67 : vector<1xf32> to vector<1x1xf32>
      %c0_31 = arith.constant 0 : index
      %c0_32 = arith.constant 0 : index
      %69 = vector.load %arg7[%c0_31, %c0_32] : memref<1x128xf32, #tpu.memory_space<vmem>>, vector<1x128xf32>
      %cst_33 = arith.constant dense<0.000000e+00> : vector<1xf32>
      %70 = vector.multi_reduction <add>, %69, %cst_33 [1] : vector<1x128xf32> to vector<1xf32>
      %71 = vector.shape_cast %70 : vector<1xf32> to vector<1x1xf32>
      %72 = tpu.iota {dimensions = array<i32: 1>} : vector<1x128xi32>
      %c0_i32_34 = arith.constant 0 : i32
      %73 = vector.broadcast %c0_i32_34 : i32 to vector<1x128xi32>
      %74 = arith.cmpi eq, %72, %73 : vector<1x128xi32>
      %cst_35 = arith.constant 0.000000e+00 : f32
      %75 = vector.shape_cast %65 : vector<1x1xf32> to vector<1x1xf32>
      %76 = vector.broadcast %75 : vector<1x1xf32> to vector<1x128xf32>
      %77 = vector.broadcast %cst_35 : f32 to vector<1x128xf32>
      %78 = arith.select %74, %76, %77 : vector<1x128xi1>, vector<1x128xf32>
      %c1_i32_36 = arith.constant 1 : i32
      %79 = vector.broadcast %c1_i32_36 : i32 to vector<1x128xi32>
      %80 = arith.cmpi eq, %72, %79 : vector<1x128xi32>
      %81 = vector.shape_cast %68 : vector<1x1xf32> to vector<1x1xf32>
      %82 = vector.broadcast %81 : vector<1x1xf32> to vector<1x128xf32>
      %83 = arith.select %80, %82, %78 : vector<1x128xi1>, vector<1x128xf32>
      %c2_i32 = arith.constant 2 : i32
      %84 = vector.broadcast %c2_i32 : i32 to vector<1x128xi32>
      %85 = arith.cmpi eq, %72, %84 : vector<1x128xi32>
      %86 = vector.shape_cast %71 : vector<1x1xf32> to vector<1x1xf32>
      %87 = vector.broadcast %86 : vector<1x1xf32> to vector<1x128xf32>
      %88 = arith.select %85, %87, %83 : vector<1x128xi1>, vector<1x128xf32>
      %c0_37 = arith.constant 0 : index
      %c0_38 = arith.constant 0 : index
      %89 = vector.load %arg4[%c0_37, %c0_38] : memref<1x128xf32, #tpu.memory_space<vmem>>, vector<1x128xf32>
      tpu.vector_store %arg4[%c0_37, %c0_38], %88 {strides = array<i32>} : memref<1x128xf32, #tpu.memory_space<vmem>>, vector<1x128xf32>,
    } else {
    }
    return
  }
  func.func @transform_0(%arg0: i32, %arg1: i32) -> (i32, i32) {
    %c1_i32 = arith.constant 1 : i32
    %0 = arith.muli %arg0, %c1_i32 : i32
    %1 = arith.addi %0, %arg1 : i32
    %c0_i32 = arith.constant 0 : i32
    %2 = arith.minsi %1, %c0_i32 : i32
    %c0_i32_0 = arith.constant 0 : i32
    %c0_i32_1 = arith.constant 0 : i32
    return %c0_i32_0, %2 : i32, i32
  }
  func.func @transform_1(%arg0: i32, %arg1: i32) -> (i32, i32) {
    %c1_i32 = arith.constant 1 : i32
    %0 = arith.muli %arg0, %c1_i32 : i32
    %1 = arith.addi %0, %arg1 : i32
    %c0_i32 = arith.constant 0 : i32
    %2 = arith.minsi %1, %c0_i32 : i32
    %c0_i32_0 = arith.constant 0 : i32
    %c0_i32_1 = arith.constant 0 : i32
    return %c0_i32_0, %2 : i32, i32
  }
  func.func @transform_2(%arg0: i32, %arg1: i32) -> (i32, i32) {
    %c0_i32 = arith.constant 0 : i32
    %c0_i32_0 = arith.constant 0 : i32
    return %c0_i32, %arg0 : i32, i32
  }
}

</mosaic_0001>

<bundles_post_ra>
// kernel: anchor_w_cross_entropy_loss.1
= control target key start
LH: loop header
LB: loop body
LE: loop exit
PB: predicated region body
PF: predicated region fallthrough
CT: control target
= control target key end

     0   :  { %v74_v0 = vlaneseq  ;;  %v214_v1 = vmov 0.0   ;;  %vm93_vm1 = vcmask 1046528   ;;  %v215_v19 = vmov -5.0   ;;  %s264_s0 = inlined_call_operand.vmem [shape: f32[15,128], index: 0, kind: input, shape index: {}]   ;;  %s265_s1 = inlined_call_operand.vmem [shape: s32[1,128], index: 1, kind: input, shape index: {}]   ;;  %s266_s2 = inlined_call_operand.vmem [shape: f32[1,128], index: 2, kind: output, shape index: {}]  }
   0x1   :  { %66 = vst [vmem:[#allocation2] sm:$0x1] %v214_v1  ;;  %v71_v2 = vld [vmem:[%s265_s1] sm:$0x1]  ;;  %67 = vst [vmem:[#allocation3] sm:$0x1] %v214_v1 }
   0x2   :  { %68 = vst [vmem:[#allocation4] sm:$0x1] %v214_v1  ;;  %v69_v3 = vld [vmem:[%s264_s0] sm:$0xff]  ;;  %v70_v4 = vld [vmem:[%s264_s0 + $0x8] sm:$0x7f]  ;;  %v240_v5 = vand.u32 127, %v74_v0 }
   0x3   :  { %v85_v6 = vshrl.u32 %v74_v0, 7  ;;  %vm151_vm0 = vcmp.ne.s32.totalorder %v71_v2, 15  ;;  %vm170_vm5 = vcmask 1040384  }
   0x4   :  { %vm78_vm2 = vcmp.lt.s32.totalorder %v240_v5, 64  ;;  %v203_v11 = vsel %vm151_vm0, 1.0, %v214_v1  ;;  %vm182_vm8 = vcmp.eq.s32.totalorder %v240_v5, 0  ;;  %vm184_vm9 = vcmp.eq.s32.totalorder %v240_v5, 1 }
   0x5   :  { %v86_v7 = vadd.s32 8, %v85_v6  ;;  %v89_v8 = vsub.s32 0, %v85_v6  ;;  %v81_v9 = vsel %vm78_vm2, %v69_v3, 0.0  ;;  %v82_v10 = vsel %vm78_vm2, %v70_v4, 0.0 }
   0x6   :  { %v94_v13 = vsel %vm93_vm1, %v82_v10, -inf  ;;  %v244_v14 = vsel %vm78_vm2, 1.0, %v214_v1  ;;  %vm186_vm10 = vcmp.eq.s32.totalorder %v240_v5, 2 }
   0x7   :  { %v90_v12 = vrot.slane %v71_v2, %v89_v8  ;;  %v95_v15 = vmax.f32 %v81_v9, %v94_v13  ;;  %v155_v16 = vmul.f32 %v203_v11, %v244_v14 }
   0x8   :  { %v159_v62 = vld [vmem:[#allocation3] sm:$0x1] }
   0x9   :  { %vm91_vm3 = vcmp.eq.s32.totalorder %v85_v6, %v90_v12  ;;  %vm92_vm4 = vcmp.eq.s32.totalorder %v86_v7, %v90_v12  ;;  %v163_v17 = vld [vmem:[#allocation4] sm:$0x1]  ;;  %v96_v18 = vrot.slane %v95_v15, 4 }
   0xa   :  { %v130_v20 = vsel %vm91_vm3, 5.0, %v215_v19  ;;  %v131_v21 = vsel %vm92_vm4, 5.0, %v215_v19  ;;  %v164_v23 = vadd.f32 %v163_v17, %v155_v16  ;;  %v120_v48 = vsel %vm92_vm4, %v82_v10, 0.0  ;;  %v156_v17 = vld [vmem:[#allocation2] sm:$0x1] }
   0xb   :  { %v132_v22 = vsub.f32 %v81_v9, %v130_v20  ;;  %v97_v24 = vmax.f32 %v95_v15, %v96_v18  ;;  %v133_v25 = vsub.f32 %v82_v10, %v131_v21  ;;  %v119_v51 = vsel %vm91_vm3, %v81_v9, 0.0 }
   0xc   :  { %165 = vst [vmem:[#allocation4] sm:$0x1] %v164_v23  ;;  %v121_v52 = vsel %vm93_vm1, %v120_v48, 0.0 }
   0xd   :  { %v134_v26 = vmul.f32 %v132_v22, %v132_v22  ;;  %v98_v27 = vrot.slane %v97_v24, 2  ;;  %v135_v28 = vmul.f32 %v133_v25, %v133_v25  ;;  %v122_v58 = vadd.f32 %v121_v52, %v119_v51 }
   0xf   :  { %v99_v29 = vmax.f32 %v97_v24, %v98_v27  ;;  %v136_v30 = vsel %vm93_vm1, %v135_v28, 0.0  ;;  %v123_v1 = vrot.slane %v122_v58, 4 }
  0x10   :  { %v137_v31 = vadd.f32 %v136_v30, %v134_v26 }
  0x11   :  { %v100_v32 = vrot.slane %v99_v29, 1  ;;  %v124_v6 = vadd.f32 %v123_v1, %v122_v58 }
  0x12   :  { %v138_v33 = vrot.slane %v137_v31, 4 }
  0x13   :  { %v101_v34 = vmax.f32 %v99_v29, %v100_v32  ;;  %v178_v35 = vld [vmem:[#allocation4] sm:$0x1]  ;;  %v125_v7 = vrot.slane %v124_v6, 2 }
  0x14   :  { %v139_v36 = vadd.f32 %v138_v33, %v137_v31  ;;  %v179_v37 = vsel %vm170_vm5, %v178_v35, 0.0 }
  0x15   :  { %v102_v38 = vsub.f32 %v81_v9, %v101_v34  ;;  %v103_v39 = vsub.f32 %v82_v10, %v101_v34  ;;  %180 = vadd.xlane.f32.xlu1 %v179_v37  ;;  %v126_v8 = vadd.f32 %v125_v7, %v124_v6 }
  0x16   :  { %v140_v40 = vrot.slane %v139_v36, 2 }
  0x17   :  { %v104_v41 = vmul.f32 1.442695, %v102_v38  ;;  %v106_v42 = vmul.f32 1.442695, %v103_v39  ;;  %v127_v9 = vrot.slane %v126_v8, 1 }
  0x18   :  { %v141_v43 = vadd.f32 %v140_v40, %v139_v36 }
  0x19   :  { %206 = vpow2.f32 %v104_v41  ;;  %v128_v12 = vadd.f32 %v127_v9, %v126_v8 }
  0x1a   :  { %208 = vpow2.f32 %v106_v42  ;;  %v142_v44 = vrot.slane %v141_v43, 1 }
  0x1c   :  { %v143_v45 = vadd.f32 %v142_v44, %v141_v43 }
  0x1e   :  { %210 = vrsqrt.f32 %v143_v45  ;;  %vm146_vm6 = vcmp.eq.f32.partialorder %v143_v45, inf  ;;  %v149_v55 = vand.u32 2147483648, %v143_v45  ;;  %vm148_vm7 = vcmp.eq.f32.partialorder %v143_v45, 0.0 }
  0x26   :  { %v207_v46 = vpop.eup %206 }
  0x27   :  { %v209_v47 = vpop.eup %208 }
  0x28   :  { %v108_v49 = vsel %vm93_vm1, %v209_v47, 0.0 }
  0x29   :  { %v109_v50 = vadd.f32 %v207_v46, %v108_v49 }
  0x2b   :  { %v211_v53 = vpop.eup %210  ;;  %v110_v54 = vrot.slane %v109_v50, 4 }
  0x2c   :  { %v145_v56 = vmul.f32 %v211_v53, %v143_v45 }
  0x2d   :  { %v111_v57 = vadd.f32 %v110_v54, %v109_v50 }
  0x2e   :  { %v147_v59 = vsel %vm146_vm6, %v143_v45, %v145_v56 }
  0x2f   :  { %v112_v60 = vrot.slane %v111_v57, 2  ;;  %v150_v61 = vsel %vm148_vm7, %v149_v55, %v147_v59 }
  0x30   :  { %v160_v63 = vmul.f32 %v155_v16, %v150_v61 }
  0x31   :  { %v113_v0 = vadd.f32 %v112_v60, %v111_v57 }
  0x32   :  { %v161_v2 = vadd.f32 %v160_v63, %v159_v62 }
  0x33   :  { %v114_v3 = vrot.slane %v113_v0, 1 }
  0x34   :  { %162 = vst [vmem:[#allocation3] sm:$0x1] %v161_v2 }
  0x35   :  { %v115_v4 = vadd.f32 %v114_v3, %v113_v0 }
  0x37   :  { %212 = vlog2.f32 %v115_v4 }
  0x3b   :  { %v174_v20 = vld [vmem:[#allocation3] sm:$0x1] }
  0x3c   :  { %v175_v22 = vsel %vm170_vm5, %v174_v20, 0.0 }
  0x44   :  { %v213_v10 = vpop.eup %212 }
  0x45   :  { %v117_v11 = vmul.f32 0.6931472, %v213_v10 }
  0x47   :  { %v118_v13 = vadd.f32 %v117_v11, %v101_v34 }
  0x49   :  { %v129_v15 = vsub.f32 %v118_v13, %v128_v12 }
  0x4b   :  { %v154_v18 = vmul.f32 %v244_v14, %v129_v15 }
  0x4d   :  { %v157_v16 = vadd.f32 %v156_v17, %v154_v18 }
  0x4f   :  { %158 = vst [vmem:[#allocation2] sm:$0x1] %v157_v16 }
  0x56   :  { %v169_v19 = vld [vmem:[#allocation2] sm:$0x1] }
  0x57   :  { %v171_v21 = vsel %vm170_vm5, %v169_v19, 0.0 }
  0x58   :  { %172 = vadd.xlane.f32.xlu0 %v171_v21 }
  0x5c   :  { %176 = vadd.xlane.f32.xlu0 %v175_v22 }
  0x9e   :  { %v181_v24 = vpop.xlane.xlu1 %180 }
  0xe1   :  { %v173_v23 = vpop.xlane.xlu0 %172 }
  0xe2   :  { %v183_v25 = vsel %vm182_vm8, %v173_v23, 0.0 }
  0xe5   :  { %v177_v14 = vpop.xlane.xlu0 %176 }
  0xe6   :  { %v185_v26 = vsel %vm184_vm9, %v177_v14, %v183_v25 }
  0xe7   :  { %v187_v27 = vsel %vm186_vm10, %v181_v24, %v185_v26 }
  0xe8   :  { %188 = vst [vmem:[%s266_s2] sm:$0x1] %v187_v27 }

</bundles_post_ra>
